<compile_context>
chip_gen: v5e
topology: v5e:2x2
jax: 0.10.0
libtpu: 0.0.40
codegen_flags: <defaults>
</compile_context>

<pallas_src>
import functools

import jax
import jax.numpy as jnp
from jax.experimental import pallas as pl
from jax.experimental.pallas import tpu as pltpu

IN_FEATURES = 10
HIDDEN = 32
OUT_FEATURES = 1
NEG_SLOPE = 0.01  # PyTorch nn.LeakyReLU() default


def _mlp_kernel(xt_ref, w1_ref, b1_ref, w2_ref, b2_ref, ot_ref):
    # xt_ref: (IN, Bt)    w1_ref: (HID, IN)   b1_ref: (HID, 1)
    # w2_ref: (OUT, HID)  b2_ref: (1, 1) SMEM ot_ref: (OUT, Bt)
    x_t = xt_ref[...]
    # First Linear (transposed): (HID, IN) @ (IN, Bt) -> (HID, Bt), f32 accumulate on MXU.
    h = jnp.dot(w1_ref[...], x_t, preferred_element_type=jnp.float32)
    h = h + b1_ref[...]
    # LeakyReLU (negative_slope = 0.01) in f32 on the VPU.
    h = jnp.where(h > 0, h, jnp.float32(NEG_SLOPE) * h)
    # Second Linear (transposed): (OUT, HID) @ (HID, Bt) -> (OUT, Bt).
    y = jnp.dot(w2_ref[...].astype(h.dtype), h, preferred_element_type=jnp.float32)
    y = y + b2_ref[0, 0]
    ot_ref[...] = y.astype(ot_ref.dtype)


def _pick_batch_block(batch, block_b):
    """Largest batch tile that is a multiple of 128, divides `batch`, and is
    <= block_b; falls back to the whole batch for small / ragged sizes."""
    if batch <= block_b or batch % 128 != 0:
        return batch
    bt = (min(block_b, batch) // 128) * 128
    while bt >= 128:
        if batch % bt == 0:
            return bt
        bt -= 128
    return batch


@functools.partial(jax.jit, static_argnames=("block_b", "stream_bf16"))
def mlp_forward(x, w1, b1, w2, b2, *, block_b=2048, stream_bf16=False):
    """x: (B, 10) as in PyTorch. w1: (32, 10), b1: (32,), w2: (1, 32), b2: (1,)
    in PyTorch nn.Linear parameter layout. Returns (B, 1) float32."""
    B = x.shape[0]
    bt = _pick_batch_block(B, block_b)
    num_blocks = B // bt

    x_t = x.T                                   # (10, B): one-time layout change
    b1_c = b1.reshape(HIDDEN, 1).astype(jnp.float32)
    b2_c = b2.reshape(1, 1).astype(jnp.float32)
    if stream_bf16:
        x_t = x_t.astype(jnp.bfloat16)
        w1 = w1.astype(jnp.bfloat16)

    vmem = pltpu.MemorySpace.VMEM
    smem = pltpu.MemorySpace.SMEM

    out_t = pl.pallas_call(
        _mlp_kernel,
        out_shape=jax.ShapeDtypeStruct((OUT_FEATURES, B), jnp.float32),
        grid_spec=pltpu.PrefetchScalarGridSpec(
            num_scalar_prefetch=0,
            grid=(num_blocks,),
            in_specs=[
                pl.BlockSpec((IN_FEATURES, bt), lambda i: (0, i)),   # x^T batch tile (pipelined)
                pl.BlockSpec(memory_space=vmem),                     # w1 resident in VMEM
                pl.BlockSpec(memory_space=vmem),                     # b1 resident in VMEM
                pl.BlockSpec(memory_space=vmem),                     # w2 resident in VMEM
                pl.BlockSpec(memory_space=smem),                     # b2 scalar in SMEM
            ],
            out_specs=pl.BlockSpec((OUT_FEATURES, bt), lambda i: (0, i)),  # lane-dense output
        ),
        compiler_params=pltpu.CompilerParams(
            dimension_semantics=("parallel",),   # batch tiles independent -> megacore on v7x
        ),
    )(x_t, w1, b1_c, w2, b2_c)

    return out_t.T                               # (B, 1), matching the PyTorch module


def init_params(key):
    """Deterministic init mimicking PyTorch nn.Linear default:
    U(-1/sqrt(fan_in), 1/sqrt(fan_in)) for weights and biases (PyTorch layout)."""
    k1, k2, k3, k4 = jax.random.split(key, 4)
    bound1 = 1.0 / (IN_FEATURES ** 0.5)
    bound2 = 1.0 / (HIDDEN ** 0.5)
    w1 = jax.random.uniform(k1, (HIDDEN, IN_FEATURES), jnp.float32, -bound1, bound1)
    b1 = jax.random.uniform(k2, (HIDDEN,), jnp.float32, -bound1, bound1)
    w2 = jax.random.uniform(k3, (OUT_FEATURES, HIDDEN), jnp.float32, -bound2, bound2)
    b2 = jax.random.uniform(k4, (OUT_FEATURES,), jnp.float32, -bound2, bound2)
    return w1, b1, w2, b2


if __name__ == "__main__":
    key = jax.random.PRNGKey(0)
    k_param, k_x = jax.random.split(key)
    w1, b1, w2, b2 = init_params(k_param)

    # Small demo batch that still exercises the tiled/gridded path (2 blocks of 128 lanes).
    B = 256
    x = jax.random.normal(k_x, (B, IN_FEATURES), jnp.float32)

    out = mlp_forward(x, w1, b1, w2, b2, block_b=128)
    out = jax.block_until_ready(out)

    # Plain-JAX reference with PyTorch semantics (Linear -> LeakyReLU -> Linear).
    h_ref = x @ w1.T + b1[None, :]
    h_ref = jnp.where(h_ref > 0, h_ref, NEG_SLOPE * h_ref)
    ref = h_ref @ w2.T + b2[None, :]

    assert out.shape == (B, OUT_FEATURES)
    assert jnp.allclose(out, ref, atol=2e-4, rtol=2e-4), float(jnp.max(jnp.abs(out - ref)))
    print("KERNEL_OK")
</pallas_src>

<mosaic_0001>
module attributes {stable_mosaic.version = 11 : i64} {
  func.func @_mlp_kernel(%arg0: i32, %arg1: memref<10x128xf32, #tpu.memory_space<vmem>>, %arg2: memref<32x10xf32, #tpu.memory_space<vmem>>, %arg3: memref<32x1xf32, #tpu.memory_space<vmem>>, %arg4: memref<1x32xf32, #tpu.memory_space<vmem>>, %arg5: memref<1x1xf32, #tpu.memory_space<smem>>, %arg6: memref<1x128xf32, #tpu.memory_space<vmem>>) attributes {dimension_semantics = [#tpu.dimension_semantics<parallel>], iteration_bounds = array<i64: 2>, scalar_prefetch = 0 : i64, scratch_operands = 0 : i64, tpu.core_type = #tpu.core_type<tc>, window_params = [{transform_indices = @transform_0, window_bounds = array<i64: 10, 128>}, {pipeline_mode = #tpu.pipeline_mode<synchronous>, transform_indices = @transform_1, window_bounds = array<i64: 32, 10>}, {pipeline_mode = #tpu.pipeline_mode<synchronous>, transform_indices = @transform_2, window_bounds = array<i64: 32, 1>}, {pipeline_mode = #tpu.pipeline_mode<synchronous>, transform_indices = @transform_3, window_bounds = array<i64: 1, 32>}, {transform_indices = @transform_4, window_bounds = array<i64: 1, 1>}, {transform_indices = @transform_5, window_bounds = array<i64: 1, 128>}]} {
    %c0 = arith.constant 0 : index
    %c0_0 = arith.constant 0 : index
    %0 = vector.load %arg1[%c0, %c0_0] : memref<10x128xf32, #tpu.memory_space<vmem>>, vector<10x128xf32>
    %c0_1 = arith.constant 0 : index
    %c0_2 = arith.constant 0 : index
    %1 = vector.load %arg2[%c0_1, %c0_2] : memref<32x10xf32, #tpu.memory_space<vmem>>, vector<32x10xf32>
    %cst = arith.constant dense<0.000000e+00> : vector<32x128xf32>
    %2 = tpu.matmul %1, %0, %cst {dimension_numbers = #tpu.dot_dimension_numbers<[1], [0], [0], [1], [0, 0, 1, 1], [], []>} : vector<32x10xf32>, vector<10x128xf32>, vector<32x128xf32> -> vector<32x128xf32>
    %c0_3 = arith.constant 0 : index
    %c0_4 = arith.constant 0 : index
    %3 = vector.load %arg3[%c0_3, %c0_4] : memref<32x1xf32, #tpu.memory_space<vmem>>, vector<32x1xf32>
    %4 = vector.broadcast %3 : vector<32x1xf32> to vector<32x128xf32>
    %5 = arith.addf %2, %4 : vector<32x128xf32>
    %cst_5 = arith.constant 0.000000e+00 : f32
    %6 = vector.broadcast %cst_5 : f32 to vector<32x128xf32>
    %7 = arith.cmpf ogt, %5, %6 : vector<32x128xf32>
    %cst_6 = arith.constant 0.00999999977 : f32
    %8 = vector.broadcast %cst_6 : f32 to vector<32x128xf32>
    %9 = arith.mulf %8, %5 : vector<32x128xf32>
    %10 = arith.select %7, %5, %9 : vector<32x128xi1>, vector<32x128xf32>
    %c0_7 = arith.constant 0 : index
    %c0_8 = arith.constant 0 : index
    %11 = vector.load %arg4[%c0_7, %c0_8] : memref<1x32xf32, #tpu.memory_space<vmem>>, vector<1x32xf32>
    %cst_9 = arith.constant dense<0.000000e+00> : vector<1x128xf32>
    %12 = tpu.matmul %11, %10, %cst_9 {dimension_numbers = #tpu.dot_dimension_numbers<[1], [0], [0], [1], [0, 0, 1, 1], [], []>} : vector<1x32xf32>, vector<32x128xf32>, vector<1x128xf32> -> vector<1x128xf32>
    %c0_10 = arith.constant 0 : index
    %c0_11 = arith.constant 0 : index
    %13 = memref.load %arg5[%c0_10, %c0_11] : memref<1x1xf32, #tpu.memory_space<smem>>
    %14 = vector.broadcast %13 : f32 to vector<1x128xf32>
    %15 = arith.addf %12, %14 : vector<1x128xf32>
    %c0_12 = arith.constant 0 : index
    %c0_13 = arith.constant 0 : index
    %16 = vector.load %arg6[%c0_12, %c0_13] : memref<1x128xf32, #tpu.memory_space<vmem>>, vector<1x128xf32>
    tpu.vector_store %arg6[%c0_12, %c0_13], %15 {strides = array<i32>} : memref<1x128xf32, #tpu.memory_space<vmem>>, vector<1x128xf32>,
    return
  }
  func.func @transform_0(%arg0: i32) -> (i32, i32) {
    %c0_i32 = arith.constant 0 : i32
    %c0_i32_0 = arith.constant 0 : i32
    return %c0_i32, %arg0 : i32, i32
  }
  func.func @transform_1(%arg0: i32) -> (i32, i32) {
    %c0_i32 = arith.constant 0 : i32
    %c0_i32_0 = arith.constant 0 : i32
    %c0_i32_1 = arith.constant 0 : i32
    return %c0_i32, %c0_i32_0 : i32, i32
  }
  func.func @transform_2(%arg0: i32) -> (i32, i32) {
    %c0_i32 = arith.constant 0 : i32
    %c0_i32_0 = arith.constant 0 : i32
    %c0_i32_1 = arith.constant 0 : i32
    return %c0_i32, %c0_i32_0 : i32, i32
  }
  func.func @transform_3(%arg0: i32) -> (i32, i32) {
    %c0_i32 = arith.constant 0 : i32
    %c0_i32_0 = arith.constant 0 : i32
    %c0_i32_1 = arith.constant 0 : i32
    return %c0_i32, %c0_i32_0 : i32, i32
  }
  func.func @transform_4(%arg0: i32) -> (i32, i32) {
    %c0_i32 = arith.constant 0 : i32
    %c0_i32_0 = arith.constant 0 : i32
    %c0_i32_1 = arith.constant 0 : i32
    return %c0_i32, %c0_i32_0 : i32, i32
  }
  func.func @transform_5(%arg0: i32) -> (i32, i32) {
    %c0_i32 = arith.constant 0 : i32
    %c0_i32_0 = arith.constant 0 : i32
    return %c0_i32, %arg0 : i32, i32
  }
}

</mosaic_0001>

<bundles_post_ra>
// kernel: mlp_forward.1
= control target key start
LH: loop header
LB: loop body
LE: loop exit
PB: predicated region body
PF: predicated region fallthrough
CT: control target
= control target key end

     0   :  { %s736_s0 = inlined_call_operand.vmem [shape: f32[10,256], index: 0, kind: input, shape index: {}]   ;;  %s737_s1 = inlined_call_operand.vmem [shape: f32[32,10], index: 1, kind: input, shape index: {}]   ;;  %s738_s2 = inlined_call_operand.vmem [shape: f32[32,1], index: 2, kind: input, shape index: {}]   ;;  %s739_s3 = inlined_call_operand.vmem [shape: f32[1,32], index: 3, kind: input, shape index: {}]   ;;  %s740_s4 = inlined_call_operand.<no memory space> [shape: f32[1,1], index: 4, kind: input, shape index: {}]   ;;  %s741_s5 = inlined_call_operand.hbm [shape: f32[1,256], index: 5, kind: output, shape index: {}]  }
   0x1   :  { %10 = sst [smem:[#allocation2]] %s740_s4 }
   0x2   :  { %11 = vsyncpa [#allocation5], 0 }
   0x3   :  { %13 = vsyncpa [#allocation5 + $0x1], 0  ;;  %s611_s20 = smov 0   ;;  %s613_s21 = smov 0  }
   0x4   :  { %s615_s22 = smov 0   ;;  %s617_s23 = smov 0  }
   0x5 LB: > { %s451_s4 = sadd.s32 4294967295, %s575_s23   ;;  %s452_s24 = sadd.s32 4294967294, %s575_s23   ;;  %s575_s23 = sphi %s617_s23, %s747_s23   ;;  %s571_s22 = sphi %s615_s22, %s746_s22   ;;  %s567_s21 = sphi %s613_s21, %s745_s21   ;;  %s563_s20 = sphi %s611_s20, %s744_s20  }
   0x6   : > { %s634_s25 = sadd.s32 1, %s575_s23   ;;  %s26_s26 = sadd.s32 1, %s571_s22 }
   0x7   : > { %s23_s27 = ssub.s32 %s575_s23, %s634_s25  ;;  %p33_p0 = scmp.ne.s32.totalorder %s571_s22, %s567_s21 }
   0x8   : > { %p24_p1 = scmp.eq.s32.totalorder %s23_s27, 0  ;;  %p34_p2 = scmp.eq.s32.totalorder %s575_s23, 0 }
   0x9   : > { %p147_p3 = scmp.eq.s32.totalorder %s451_s4, 1  ;;  %p152_p4 = scmp.ne.s32.totalorder %s567_s21, %s563_s20 }
   0xa   : > { %s647_s28 = scalar_select %p24_p1, %s571_s22, %s26_s26  }
   0xb   : > { %p35_p5 = por %p34_p2, %p33_p0  ;;  %p649_p6 = por %p147_p3, %p33_p0 }
   0xc   : > { %p153_p7 = scmp.eq.s32.totalorder %s452_s24, 1  ;;  %p454_p9 = scmp.ge.s32.totalorder %s575_s23, 2 }
   0xe   : > { %p653_p8 = por %p153_p7, %p152_p4  ;;  %181 = sbr.rel (%p454_p9) target bundleno = 25 (0x19), region = 32 }
  0x13   : > { %184 = sbr.rel (!%p35_p5) target bundleno = 25 (0x19), region = 36  ;;  %s186_s6 = sand.u32 (%p35_p5), 1, %s571_s22  }
  0x14   : > { %s456_s7 = sshll.u32 (%p35_p5), %s575_s23, 3  ;;  %s455_s8 = sshll.u32 (%p35_p5), %s186_s6, 4 }
  0x15   : > { %s190_s11 = scalar_lea.vmem (%p35_p5), %s736_s0, %s456_s7  ;;  %s188_s12 = scalar_lea.vmem (%p35_p5), [#allocation3], %s455_s8 }
  0x16   : > { %v221_v0 = vld [vmem:[%s190_s11] sm:$0xff] (%p35_p5)  ;;  %v223_v1 = vld [vmem:[%s190_s11 + $0x10] sm:$0xff] (%p35_p5) }
  0x17   : > { %222 = vst [vmem:[%s188_s12] sm:$0xff] (%p35_p5), %v221_v0 }
  0x18   : > { %224 = vst [vmem:[%s188_s12 + $0x8] sm:$0xff] %v223_v1 }
  0x19 PF: > { %p457_p10 = scmp.ge.s32.totalorder %s575_s23, 1  ;;  %p229_p11 = scmp.lt.s32.totalorder %s575_s23, 3 }
  0x1b   : > { %p230_p12 = pnand %p457_p10, %p229_p11 }
  0x1c   : > { %s668_s13 = sand.u32 (!%p230_p12), 1, %s567_s21   ;;  %s351_s18 = sld [smem:[#allocation2]] (!%p230_p12) }
  0x1d   : > { %233 = sbr.rel (%p230_p12) target bundleno = 321 (0x141), region = 74  ;;  %s458_s14 = sshll.u32 (!%p230_p12), %s668_s13, 4 }
  0x1e   : > { %s238_s19 = scalar_lea.vmem (!%p230_p12), [#allocation3], %s458_s14  ;;  %s387_s26 = scalar_lea.hbm (!%p230_p12), %s741_s5, %s451_s4 }
  0x1f   : > { %s261_s27 = scalar_lea.vmem (!%p230_p12), [#allocation4], %s668_s13  ;;  %s391_s7 = sshll.u32 (!%p230_p12), %s387_s26, 4  ;;  %s392_s7 = int_to_ptr.hbm [resolvable:$true] %s391_s7 }
  0x20   : > { %s389_s6 = sshll.u32 (!%p230_p12), %s261_s27, 4  ;;  %s379_s8 = scalar_lea.sflag (!%p230_p12), [#allocation5], %s668_s13  ;;  %s390_s6 = int_to_ptr.vmem [resolvable:$true] %s389_s6 }
  0x21   : > { %s527_s9 = sshra.s32 (!%p230_p12), %s392_s7, 4  ;;  %s533_s4 = scalar_lea.hbm (!%p230_p12), %s741_s5, 2  ;;  %s528_s9 = int_to_ptr.hbm [resolvable:$true] %s527_s9 }
  0x22   : > { %vm305_vm0 = vcmask 1041408   ;;  %v577_v2 = vmov 0   ;;  %v271_v3 = vld [vmem:[%s738_s2 + $0x18] sm:$0xff]  ;;  %v269_v4 = vld [vmem:[%s738_s2 + $0x8] sm:$0xff]  ;;  %v262_v6 = vld [vmem:[%s238_s19] sm:$0xff]  ;;  %vm292_vm1 = vcmask 80896   ;;  %v352_v34 = vstv %s351_s18  ;;  %p534_p2 = scmp.lt.s32.totalorder %s528_s9, %s741_s5 }
  0x23   : > { %511 = vset.pattern.permute.xlu0 %v577_v2  ;;  %512 = vset.pattern.permute.xlu1 %v577_v2  ;;  %v263_v5 = vld [vmem:[%s238_s19 + $0x8] sm:$0x3]  ;;  %v264_v9 = vld [vmem:[%s737_s1] sm:$0xff]  ;;  %v270_v10 = vld [vmem:[%s738_s2 + $0x10] sm:$0xff]  ;;  %vm353_vm6 = vcmask 261120   ;;  %s529_s10 = scalar_lea.hbm %s528_s9, 1 }
  0x24   : > { %289 = vperm.xlu0 %511, %v271_v3   ;;  %279 = vperm.xlu1 %512, %v269_v4   ;;  %v265_v7 = vld [vmem:[%s737_s1 + $0x8] sm:$0xff]  ;;  %v267_v8 = vld [vmem:[%s737_s1 + $0x18] sm:$0xff]  ;;  %v268_v11 = vld [vmem:[%s738_s2] sm:$0xff]  ;;  %p530_p13 = scmp.ne.s32.totalorder %s528_s9, %s529_s10  ;;  %p535_p3 = scmp.lt.s32.totalorder %s533_s4, %s529_s10 }
  0x25   : > { %467 = vmatpush.msk.msra.mxu2 %vm305_vm0, %v263_v5  ;;  %468 = vmatpush.msk.msra.mxu3 %vm305_vm0, %v263_v5  ;;  %v266_v12 = vld [vmem:[%s737_s1 + $0x10] sm:$0xff]  ;;  %v350_v32 = vld [vmem:[%s739_s3] sm:$0x1] }
  0x26   : > { %459 = vmatpush.msk.msra.mxu0 %vm305_vm0, %v263_v5  ;;  %p531_p0 = pnand %p530_p13, %p649_p6  ;;  %p536_p4 = por %p535_p3, %p534_p2 }
  0x27   : > { %469 = vmatpush.msra.mxu2 %v262_v6  ;;  %470 = vmatpush.msra.mxu3 %v262_v6 }
  0x28   : > { %461 = vmatmul.msk.f32.vlgmr.msra.gmra.mxu2 %vm292_vm1, %v265_v7  ;;  %463 = vmatmul.msk.f32.vlgmr.msra.gmra.mxu3 %vm292_vm1, %v267_v8  ;;  %p532_p1 = pneg %p531_p0 }
  0x29   : > { %324 = vmatpush.msra.mxu0 %v262_v6 }
  0x2a   : > { %460 = vmatmul.msk.f32.vlgmr.msra.gmra.mxu0 %vm292_vm1, %v264_v9  ;;  %p537_p5 = pnand %p536_p4, %p532_p1 }
  0x2c   : > { %284 = vperm.xlu0 %511, %v270_v10   ;;  %274 = vperm.xlu1 %512, %v268_v11  }
  0x30   : > { %462 = vmatmul.msk.f32.gmra.mxu2 %vm292_vm1, %v266_v12 }
  0x96   : > { %v280_v13 = vpop.permute.xlu1 %279  ;;  %v290_v14 = vpop.permute.xlu0 %289 }
  0x9e   : > { %v275_v20 = vpop.permute.xlu1 %274  ;;  %v285_v23 = vpop.permute.xlu0 %284 }
  0xa7   : > { %v326_v21 = vpop.f32.mrf.mxu0 }
  0xa8   : > { %v327_v25 = vadd.f32 %v326_v21, %v275_v20 }
  0xaa   : > { %v342_v30 = vmul.f32 0.01, %v327_v25  ;;  %vm338_vm5 = vcmp.gt.f32.partialorder %v327_v25, 0.0 }
  0xab   : > { %v329_v15 = vpop.f32.mrf.mxu2  ;;  %v335_v16 = vpop.f32.mrf.mxu3 }
  0xac   : > { %v336_v17 = vadd.f32 %v335_v16, %v290_v14  ;;  %v330_v22 = vadd.f32 %v329_v15, %v280_v13  ;;  %v346_v33 = vsel %vm338_vm5, %v327_v25, %v342_v30 }
  0xae   : > { %vm341_vm2 = vcmp.gt.f32.partialorder %v336_v17, 0.0  ;;  %v345_v18 = vmul.f32 0.01, %v336_v17  ;;  %v343_v28 = vmul.f32 0.01, %v330_v22  ;;  %vm339_vm4 = vcmp.gt.f32.partialorder %v330_v22, 0.0 }
  0xb0   : > { %v349_v19 = vsel %vm341_vm2, %v336_v17, %v345_v18  ;;  %v347_v31 = vsel %vm339_vm4, %v330_v22, %v343_v28 }
  0xb1   : > { %369 = vmatpush.msra.mxu1 %v349_v19 }
  0xb3   : > { %v332_v24 = vpop.f32.mrf.mxu2 }
  0xb4   : > { %v333_v26 = vadd.f32 %v332_v24, %v285_v23 }
  0xb6   : > { %vm340_vm3 = vcmp.gt.f32.partialorder %v333_v26, 0.0  ;;  %v344_v27 = vmul.f32 0.01, %v333_v26 }
  0xb8   : > { %v348_v29 = vsel %vm340_vm3, %v333_v26, %v344_v27 }
  0xb9   : > { %370 = vmatpush.msra.mxu1 %v348_v29 }
  0xbb   : > { %371 = vmatpush.msra.mxu1 %v347_v31 }
  0xbd   : > { %372 = vmatpush.msra.mxu1 %v346_v33 }
  0xbe   : > { %464 = vmatmul.msk.f32.vlgmr.msra.gmra.mxu1 %vm353_vm6, %v350_v32 }
 0x13b   : > { %v374_v35 = vpop.f32.mrf.mxu1 }
 0x13c   : > { %v375_v36 = vadd.f32 %v374_v35, %v352_v34 }
 0x13e   : > { %377 = vst [vmem:[%s261_s27] sm:$0x1] %v375_v36 }
 0x13f   : > { %540 = shalt.err (!%p537_p5)
}
 0x140   : > { %471 = dma.vmem_to_hbm [thread:$0]  (%p649_p6), %s390_s6, 16, %s392_s7, %s379_s8  }
 0x141 PF: > { %s403_s13 = sand.u32 1, %s563_s20   ;;  %p474_p7 = pnand %p454_p9, %p653_p8 }
 0x142   : > { %s404_s16 = scalar_lea.sflag [#allocation5], %s403_s13 }
 0x143   : > { %p475_p10 = pneg %p474_p7 }
 0x145   : > { %558 = dma.done.wait (%p475_p10), %s404_s16, 16  }
 0x146   : > { %560 = vsyncadd (%p475_p10), %s404_s16, 4294967280  ;;  %p16_p11 = scmp.ge.s32.totalorder %s634_s25, 4   ;;  %s744_s20 = smov %s567_s21 }
 0x147   : > { %s745_s21 = smov %s571_s22  ;;  %s746_s22 = smov %s647_s28 }
 0x148   : > { %s747_s23 = smov %s634_s25  ;;  %18 = sbr.rel (!%p16_p11) target bundleno = 5 (0x5), region = 118 }
 0x14d   :  { %409 = vsyncpa [#allocation5], 1 }
 0x14e   :  { %411 = vsyncpa [#allocation5 + $0x1], 1 }

</bundles_post_ra>
